<compile_context>
chip_gen: v7x
topology: tpu7x:2x2x1
jax: 0.10.0
libtpu: 0.0.40
codegen_flags: <defaults>
</compile_context>

<pallas_src>
import functools

import jax
import jax.numpy as jnp
from jax.experimental import pallas as pl
from jax.experimental.pallas import tpu as pltpu


def _lightconv_kernel(x_ref, w1_ref, b1_ref, w2_ref, b2_ref, mask_ref,
                      o_ref, y1buf_ref,
                      *, C2, H, W, K, P, L, F, Lbuf):
    """Fused LightConv for one batch element.

    x_ref:    (1, C1, L)    input image, L = H*W (lane-dense)
    w1_ref:   (C2, C1)      1x1 conv weights, BN1 scale folded, bf16
    b1_ref:   (C2, 1)       BN1 folded bias (f32)
    w2_ref:   (C2, K*K)     depthwise weights, BN2 scale folded (f32)
    b2_ref:   (C2, 1)       BN2 folded bias (f32)
    mask_ref: (K, L)        per-kw lane masks (1.0 where the tap stays in-row)
    o_ref:    (1, C2, L)    output (lane-dense store)
    y1buf_ref:(C2, Lbuf)    VMEM scratch: zero-padded flat conv1 output
    """
    # ---- conv1: 1x1 pointwise conv (one bf16 MXU matmul) + folded-BN bias, act=Identity
    xb = x_ref[0].astype(jnp.bfloat16)                                 # (C1, L)
    y1 = jnp.dot(w1_ref[...], xb, preferred_element_type=jnp.float32)  # (C2, L) f32
    y1 = y1 + b1_ref[...]                                              # (C2,1) lane-broadcast

    # ---- stage conv1 output into the zero-padded flat buffer
    # layout: y1(h, w) lives at flat index F + h*W + w; the F-sized front/back pads
    # (zeros) provide the H-direction 'same' padding automatically.
    y1buf_ref[...] = jnp.zeros((C2, Lbuf), jnp.float32)
    y1buf_ref[:, F:F + L] = y1

    # ---- conv2: depthwise KxK conv + folded-BN bias + ReLU (lane-dense VPU)
    acc = jnp.zeros((C2, L), jnp.float32)
    for kh in range(K):
        for kw in range(K):
            s = kh * W + kw                       # constant lane offset for this tap
            tap = y1buf_ref[:, s:s + L]           # (C2, L)
            wcol = w2_ref[:, kh * K + kw:kh * K + kw + 1]   # (C2, 1) per-channel weight
            m_row = mask_ref[kw:kw + 1, :]        # (1, L) W-boundary mask
            acc = acc + (tap * m_row) * wcol
    y2 = acc + b2_ref[...]
    o_ref[0] = jnp.maximum(y2, 0.0).astype(o_ref.dtype)    # ReLU


def light_conv(x_nchw, params, *, eps=1e-5):
    """LightConv forward. Input/output are NCHW (PyTorch convention)."""
    N, C1, H, W = x_nchw.shape
    w1 = params["w1"]                      # (C2, C1, 1, 1)
    w2 = params["w2"]                      # (C2, 1, K, K)  depthwise
    C2 = w1.shape[0]
    K = w2.shape[2]
    P = K // 2                             # autopad(k)
    L = H * W
    F = P * (W + 1)                        # front pad of the flat buffer
    Lbuf = L + 2 * P * (W + 1)

    # Fold eval-mode BatchNorm (running stats) into weights/bias.
    s1 = params["g1"] / jnp.sqrt(params["v1"] + eps)
    b1 = params["b1"] - params["m1"] * s1
    s2 = params["g2"] / jnp.sqrt(params["v2"] + eps)
    b2 = params["b2"] - params["m2"] * s2

    w1m = (w1[:, :, 0, 0] * s1[:, None]).astype(jnp.bfloat16)              # (C2, C1)
    w2m = (w2[:, 0].reshape(C2, K * K) * s2[:, None]).astype(jnp.float32)  # (C2, K*K)
    b1c = b1.reshape(C2, 1).astype(jnp.float32)
    b2c = b2.reshape(C2, 1).astype(jnp.float32)

    # Per-kw lane masks: a depthwise tap at horizontal offset (kw - P) is valid
    # only where the shifted column index stays inside [0, W).
    w_pos = jnp.arange(L, dtype=jnp.int32) % W
    mask_arr = jnp.stack(
        [((w_pos + (kw - P) >= 0) & (w_pos + (kw - P) < W)).astype(jnp.float32)
         for kw in range(K)], axis=0)                                       # (K, L)

    x_flat = x_nchw.reshape(N, C1, L)      # free contiguous reshape, no transpose

    kernel = functools.partial(_lightconv_kernel,
                               C2=C2, H=H, W=W, K=K, P=P, L=L, F=F, Lbuf=Lbuf)

    out_flat = pl.pallas_call(
        kernel,
        out_shape=jax.ShapeDtypeStruct((N, C2, L), x_nchw.dtype),
        grid=(N,),
        in_specs=[
            pl.BlockSpec((1, C1, L), lambda n: (n, 0, 0)),
            pl.BlockSpec((C2, C1), lambda n: (0, 0)),
            pl.BlockSpec((C2, 1), lambda n: (0, 0)),
            pl.BlockSpec((C2, K * K), lambda n: (0, 0)),
            pl.BlockSpec((C2, 1), lambda n: (0, 0)),
            pl.BlockSpec((K, L), lambda n: (0, 0)),
        ],
        out_specs=pl.BlockSpec((1, C2, L), lambda n: (n, 0, 0)),
        scratch_shapes=[pltpu.VMEM((C2, Lbuf), jnp.float32)],
        compiler_params=pltpu.CompilerParams(dimension_semantics=("parallel",)),
    )(x_flat, w1m, b1c, w2m, b2c, mask_arr)

    return out_flat.reshape(N, C2, H, W)


def init_lightconv_params(key, c1, c2, k):
    """Deterministic synthetic parameters with the shapes LightConv.__init__ implies."""
    ks = jax.random.split(key, 10)

    def rn(kk, shape, s=0.1):
        return (s * jax.random.normal(kk, shape)).astype(jnp.float32)

    return {
        # conv1 = Conv(c1, c2, 1, act=False): Conv2d(c1,c2,1,bias=False) + BN(c2) + Identity
        "w1": rn(ks[0], (c2, c1, 1, 1)),
        "g1": 1.0 + rn(ks[1], (c2,)), "b1": rn(ks[2], (c2,)),
        "m1": rn(ks[3], (c2,)), "v1": 1.0 + jnp.abs(rn(ks[4], (c2,))),
        # conv2 = DWConv(c2, c2, k, act=ReLU): Conv2d(c2,c2,k,p=k//2,groups=c2,bias=False) + BN(c2) + ReLU
        "w2": rn(ks[5], (c2, 1, k, k)),
        "g2": 1.0 + rn(ks[6], (c2,)), "b2": rn(ks[7], (c2,)),
        "m2": rn(ks[8], (c2,)), "v2": 1.0 + jnp.abs(rn(ks[9], (c2,))),
    }


def _reference(x, params, eps=1e-5):
    """Pure-JAX (lax conv, f32) reference for a correctness sanity check."""
    def conv_bn_act(x, w, g, b, m, v, groups, act):
        kh, kw = w.shape[2], w.shape[3]
        y = jax.lax.conv_general_dilated(
            x, w, window_strides=(1, 1),
            padding=[(kh // 2, kh // 2), (kw // 2, kw // 2)],
            dimension_numbers=("NCHW", "OIHW", "NCHW"),
            feature_group_count=groups)
        s = (g / jnp.sqrt(v + eps)).reshape(1, -1, 1, 1)
        bb = (b - m * g / jnp.sqrt(v + eps)).reshape(1, -1, 1, 1)
        return act(y * s + bb)

    y = conv_bn_act(x, params["w1"], params["g1"], params["b1"],
                    params["m1"], params["v1"], 1, lambda t: t)          # act=False -> Identity
    z = conv_bn_act(y, params["w2"], params["g2"], params["b2"],
                    params["m2"], params["v2"], params["w2"].shape[0], jax.nn.relu)
    return z


if __name__ == "__main__":
    key = jax.random.PRNGKey(0)
    k_x, k_p = jax.random.split(key)

    c1, c2, k = 4, 8, 3                    # LightConv(c1=4, c2=8, k=3, act=ReLU)
    x = jax.random.normal(k_x, (2, c1, 16, 16), dtype=jnp.float32)  # NCHW
    params = init_lightconv_params(k_p, c1, c2, k)

    out = jax.block_until_ready(light_conv(x, params))
    assert out.shape == (2, c2, 16, 16), out.shape

    ref = jax.block_until_ready(_reference(x, params))
    # bf16 MXU operands for the 1x1 conv introduce ~1e-2-level deviation vs the
    # pure-f32 reference at these magnitudes; use a correspondingly loose tolerance.
    max_err = float(jnp.max(jnp.abs(out - ref)))
    assert jnp.allclose(out, ref, rtol=5e-2, atol=5e-2), max_err

    print("KERNEL_OK")
</pallas_src>

<mosaic_0001>
module attributes {stable_mosaic.version = 11 : i64} {
  func.func @_lightconv_kernel(%arg0: i32, %arg1: memref<1x4x256xf32, #tpu.memory_space<vmem>>, %arg2: memref<8x4xbf16, #tpu.memory_space<vmem>>, %arg3: memref<8x1xf32, #tpu.memory_space<vmem>>, %arg4: memref<8x9xf32, #tpu.memory_space<vmem>>, %arg5: memref<8x1xf32, #tpu.memory_space<vmem>>, %arg6: memref<3x256xf32, #tpu.memory_space<vmem>>, %arg7: memref<1x8x256xf32, #tpu.memory_space<vmem>>, %arg8: memref<8x290xf32, #tpu.memory_space<vmem>>) attributes {dimension_semantics = [#tpu.dimension_semantics<parallel>], iteration_bounds = array<i64: 2>, scalar_prefetch = 0 : i64, scratch_operands = 1 : i64, tpu.core_type = #tpu.core_type<tc>, window_params = [{transform_indices = @transform_0, window_bounds = array<i64: 1, 4, 256>}, {pipeline_mode = #tpu.pipeline_mode<synchronous>, transform_indices = @transform_1, window_bounds = array<i64: 8, 4>}, {pipeline_mode = #tpu.pipeline_mode<synchronous>, transform_indices = @transform_2, window_bounds = array<i64: 8, 1>}, {pipeline_mode = #tpu.pipeline_mode<synchronous>, transform_indices = @transform_3, window_bounds = array<i64: 8, 9>}, {pipeline_mode = #tpu.pipeline_mode<synchronous>, transform_indices = @transform_4, window_bounds = array<i64: 8, 1>}, {pipeline_mode = #tpu.pipeline_mode<synchronous>, transform_indices = @transform_5, window_bounds = array<i64: 3, 256>}, {transform_indices = @transform_6, window_bounds = array<i64: 1, 8, 256>}]} {
    %c0 = arith.constant 0 : index
    %c0_0 = arith.constant 0 : index
    %c0_1 = arith.constant 0 : index
    %0 = vector.load %arg1[%c0, %c0_0, %c0_1] : memref<1x4x256xf32, #tpu.memory_space<vmem>>, vector<1x4x256xf32>
    %1 = vector.shape_cast %0 : vector<1x4x256xf32> to vector<4x256xf32>
    %2 = arith.truncf %1 : vector<4x256xf32> to vector<4x256xbf16>
    %c0_2 = arith.constant 0 : index
    %c0_3 = arith.constant 0 : index
    %3 = vector.load %arg2[%c0_2, %c0_3] : memref<8x4xbf16, #tpu.memory_space<vmem>>, vector<8x4xbf16>
    %cst = arith.constant dense<0.000000e+00> : vector<8x256xf32>
    %4 = tpu.matmul %3, %2, %cst {dimension_numbers = #tpu.dot_dimension_numbers<[1], [0], [0], [1], [0, 0, 1, 1], [], []>} : vector<8x4xbf16>, vector<4x256xbf16>, vector<8x256xf32> -> vector<8x256xf32>
    %c0_4 = arith.constant 0 : index
    %c0_5 = arith.constant 0 : index
    %5 = vector.load %arg3[%c0_4, %c0_5] : memref<8x1xf32, #tpu.memory_space<vmem>>, vector<8x1xf32>
    %6 = vector.broadcast %5 : vector<8x1xf32> to vector<8x256xf32>
    %7 = arith.addf %4, %6 : vector<8x256xf32>
    %cst_6 = arith.constant 0.000000e+00 : f32
    %8 = vector.broadcast %cst_6 : f32 to vector<8x290xf32>
    %c0_7 = arith.constant 0 : index
    %c0_8 = arith.constant 0 : index
    %9 = vector.load %arg8[%c0_7, %c0_8] : memref<8x290xf32, #tpu.memory_space<vmem>>, vector<8x290xf32>
    tpu.vector_store %arg8[%c0_7, %c0_8], %8 {strides = array<i32>} : memref<8x290xf32, #tpu.memory_space<vmem>>, vector<8x290xf32>,
    %c0_9 = arith.constant 0 : index
    %c17 = arith.constant 17 : index
    %10 = vector.load %arg8[%c0_9, %c17] : memref<8x290xf32, #tpu.memory_space<vmem>>, vector<8x256xf32>
    tpu.vector_store %arg8[%c0_9, %c17], %7 {strides = array<i32>} : memref<8x290xf32, #tpu.memory_space<vmem>>, vector<8x256xf32>,
    %cst_10 = arith.constant 0.000000e+00 : f32
    %11 = vector.broadcast %cst_10 : f32 to vector<8x256xf32>
    %c0_11 = arith.constant 0 : index
    %c0_12 = arith.constant 0 : index
    %12 = vector.load %arg8[%c0_11, %c0_12] : memref<8x290xf32, #tpu.memory_space<vmem>>, vector<8x256xf32>
    %c0_13 = arith.constant 0 : index
    %c0_14 = arith.constant 0 : index
    %13 = vector.load %arg4[%c0_13, %c0_14] : memref<8x9xf32, #tpu.memory_space<vmem>>, vector<8x1xf32>
    %c0_15 = arith.constant 0 : index
    %c0_16 = arith.constant 0 : index
    %14 = vector.load %arg6[%c0_15, %c0_16] : memref<3x256xf32, #tpu.memory_space<vmem>>, vector<1x256xf32>
    %15 = vector.broadcast %14 : vector<1x256xf32> to vector<8x256xf32>
    %16 = arith.mulf %12, %15 : vector<8x256xf32>
    %17 = vector.broadcast %13 : vector<8x1xf32> to vector<8x256xf32>
    %18 = arith.mulf %16, %17 : vector<8x256xf32>
    %19 = arith.addf %11, %18 : vector<8x256xf32>
    %c0_17 = arith.constant 0 : index
    %c1 = arith.constant 1 : index
    %20 = vector.load %arg8[%c0_17, %c1] : memref<8x290xf32, #tpu.memory_space<vmem>>, vector<8x256xf32>
    %c0_18 = arith.constant 0 : index
    %c1_19 = arith.constant 1 : index
    %21 = vector.load %arg4[%c0_18, %c1_19] : memref<8x9xf32, #tpu.memory_space<vmem>>, vector<8x1xf32>
    %c1_20 = arith.constant 1 : index
    %c0_21 = arith.constant 0 : index
    %22 = vector.load %arg6[%c1_20, %c0_21] : memref<3x256xf32, #tpu.memory_space<vmem>>, vector<1x256xf32>
    %23 = vector.broadcast %22 : vector<1x256xf32> to vector<8x256xf32>
    %24 = arith.mulf %20, %23 : vector<8x256xf32>
    %25 = vector.broadcast %21 : vector<8x1xf32> to vector<8x256xf32>
    %26 = arith.mulf %24, %25 : vector<8x256xf32>
    %27 = arith.addf %19, %26 : vector<8x256xf32>
    %c0_22 = arith.constant 0 : index
    %c2 = arith.constant 2 : index
    %28 = vector.load %arg8[%c0_22, %c2] : memref<8x290xf32, #tpu.memory_space<vmem>>, vector<8x256xf32>
    %c0_23 = arith.constant 0 : index
    %c2_24 = arith.constant 2 : index
    %29 = vector.load %arg4[%c0_23, %c2_24] : memref<8x9xf32, #tpu.memory_space<vmem>>, vector<8x1xf32>
    %c2_25 = arith.constant 2 : index
    %c0_26 = arith.constant 0 : index
    %30 = vector.load %arg6[%c2_25, %c0_26] : memref<3x256xf32, #tpu.memory_space<vmem>>, vector<1x256xf32>
    %31 = vector.broadcast %30 : vector<1x256xf32> to vector<8x256xf32>
    %32 = arith.mulf %28, %31 : vector<8x256xf32>
    %33 = vector.broadcast %29 : vector<8x1xf32> to vector<8x256xf32>
    %34 = arith.mulf %32, %33 : vector<8x256xf32>
    %35 = arith.addf %27, %34 : vector<8x256xf32>
    %c0_27 = arith.constant 0 : index
    %c16 = arith.constant 16 : index
    %36 = vector.load %arg8[%c0_27, %c16] : memref<8x290xf32, #tpu.memory_space<vmem>>, vector<8x256xf32>
    %c0_28 = arith.constant 0 : index
    %c3 = arith.constant 3 : index
    %37 = vector.load %arg4[%c0_28, %c3] : memref<8x9xf32, #tpu.memory_space<vmem>>, vector<8x1xf32>
    %c0_29 = arith.constant 0 : index
    %c0_30 = arith.constant 0 : index
    %38 = vector.load %arg6[%c0_29, %c0_30] : memref<3x256xf32, #tpu.memory_space<vmem>>, vector<1x256xf32>
    %39 = vector.broadcast %38 : vector<1x256xf32> to vector<8x256xf32>
    %40 = arith.mulf %36, %39 : vector<8x256xf32>
    %41 = vector.broadcast %37 : vector<8x1xf32> to vector<8x256xf32>
    %42 = arith.mulf %40, %41 : vector<8x256xf32>
    %43 = arith.addf %35, %42 : vector<8x256xf32>
    %c0_31 = arith.constant 0 : index
    %c17_32 = arith.constant 17 : index
    %44 = vector.load %arg8[%c0_31, %c17_32] : memref<8x290xf32, #tpu.memory_space<vmem>>, vector<8x256xf32>
    %c0_33 = arith.constant 0 : index
    %c4 = arith.constant 4 : index
    %45 = vector.load %arg4[%c0_33, %c4] : memref<8x9xf32, #tpu.memory_space<vmem>>, vector<8x1xf32>
    %c1_34 = arith.constant 1 : index
    %c0_35 = arith.constant 0 : index
    %46 = vector.load %arg6[%c1_34, %c0_35] : memref<3x256xf32, #tpu.memory_space<vmem>>, vector<1x256xf32>
    %47 = vector.broadcast %46 : vector<1x256xf32> to vector<8x256xf32>
    %48 = arith.mulf %44, %47 : vector<8x256xf32>
    %49 = vector.broadcast %45 : vector<8x1xf32> to vector<8x256xf32>
    %50 = arith.mulf %48, %49 : vector<8x256xf32>
    %51 = arith.addf %43, %50 : vector<8x256xf32>
    %c0_36 = arith.constant 0 : index
    %c18 = arith.constant 18 : index
    %52 = vector.load %arg8[%c0_36, %c18] : memref<8x290xf32, #tpu.memory_space<vmem>>, vector<8x256xf32>
    %c0_37 = arith.constant 0 : index
    %c5 = arith.constant 5 : index
    %53 = vector.load %arg4[%c0_37, %c5] : memref<8x9xf32, #tpu.memory_space<vmem>>, vector<8x1xf32>
    %c2_38 = arith.constant 2 : index
    %c0_39 = arith.constant 0 : index
    %54 = vector.load %arg6[%c2_38, %c0_39] : memref<3x256xf32, #tpu.memory_space<vmem>>, vector<1x256xf32>
    %55 = vector.broadcast %54 : vector<1x256xf32> to vector<8x256xf32>
    %56 = arith.mulf %52, %55 : vector<8x256xf32>
    %57 = vector.broadcast %53 : vector<8x1xf32> to vector<8x256xf32>
    %58 = arith.mulf %56, %57 : vector<8x256xf32>
    %59 = arith.addf %51, %58 : vector<8x256xf32>
    %c0_40 = arith.constant 0 : index
    %c32 = arith.constant 32 : index
    %60 = vector.load %arg8[%c0_40, %c32] : memref<8x290xf32, #tpu.memory_space<vmem>>, vector<8x256xf32>
    %c0_41 = arith.constant 0 : index
    %c6 = arith.constant 6 : index
    %61 = vector.load %arg4[%c0_41, %c6] : memref<8x9xf32, #tpu.memory_space<vmem>>, vector<8x1xf32>
    %c0_42 = arith.constant 0 : index
    %c0_43 = arith.constant 0 : index
    %62 = vector.load %arg6[%c0_42, %c0_43] : memref<3x256xf32, #tpu.memory_space<vmem>>, vector<1x256xf32>
    %63 = vector.broadcast %62 : vector<1x256xf32> to vector<8x256xf32>
    %64 = arith.mulf %60, %63 : vector<8x256xf32>
    %65 = vector.broadcast %61 : vector<8x1xf32> to vector<8x256xf32>
    %66 = arith.mulf %64, %65 : vector<8x256xf32>
    %67 = arith.addf %59, %66 : vector<8x256xf32>
    %c0_44 = arith.constant 0 : index
    %c33 = arith.constant 33 : index
    %68 = vector.load %arg8[%c0_44, %c33] : memref<8x290xf32, #tpu.memory_space<vmem>>, vector<8x256xf32>
    %c0_45 = arith.constant 0 : index
    %c7 = arith.constant 7 : index
    %69 = vector.load %arg4[%c0_45, %c7] : memref<8x9xf32, #tpu.memory_space<vmem>>, vector<8x1xf32>
    %c1_46 = arith.constant 1 : index
    %c0_47 = arith.constant 0 : index
    %70 = vector.load %arg6[%c1_46, %c0_47] : memref<3x256xf32, #tpu.memory_space<vmem>>, vector<1x256xf32>
    %71 = vector.broadcast %70 : vector<1x256xf32> to vector<8x256xf32>
    %72 = arith.mulf %68, %71 : vector<8x256xf32>
    %73 = vector.broadcast %69 : vector<8x1xf32> to vector<8x256xf32>
    %74 = arith.mulf %72, %73 : vector<8x256xf32>
    %75 = arith.addf %67, %74 : vector<8x256xf32>
    %c0_48 = arith.constant 0 : index
    %c34 = arith.constant 34 : index
    %76 = vector.load %arg8[%c0_48, %c34] : memref<8x290xf32, #tpu.memory_space<vmem>>, vector<8x256xf32>
    %c0_49 = arith.constant 0 : index
    %c8 = arith.constant 8 : index
    %77 = vector.load %arg4[%c0_49, %c8] : memref<8x9xf32, #tpu.memory_space<vmem>>, vector<8x1xf32>
    %c2_50 = arith.constant 2 : index
    %c0_51 = arith.constant 0 : index
    %78 = vector.load %arg6[%c2_50, %c0_51] : memref<3x256xf32, #tpu.memory_space<vmem>>, vector<1x256xf32>
    %79 = vector.broadcast %78 : vector<1x256xf32> to vector<8x256xf32>
    %80 = arith.mulf %76, %79 : vector<8x256xf32>
    %81 = vector.broadcast %77 : vector<8x1xf32> to vector<8x256xf32>
    %82 = arith.mulf %80, %81 : vector<8x256xf32>
    %83 = arith.addf %75, %82 : vector<8x256xf32>
    %c0_52 = arith.constant 0 : index
    %c0_53 = arith.constant 0 : index
    %84 = vector.load %arg5[%c0_52, %c0_53] : memref<8x1xf32, #tpu.memory_space<vmem>>, vector<8x1xf32>
    %85 = vector.broadcast %84 : vector<8x1xf32> to vector<8x256xf32>
    %86 = arith.addf %83, %85 : vector<8x256xf32>
    %cst_54 = arith.constant 0.000000e+00 : f32
    %87 = vector.broadcast %cst_54 : f32 to vector<8x256xf32>
    %88 = arith.maximumf %86, %87 : vector<8x256xf32>
    %c0_55 = arith.constant 0 : index
    %c0_56 = arith.constant 0 : index
    %c0_57 = arith.constant 0 : index
    %89 = vector.load %arg7[%c0_55, %c0_56, %c0_57] : memref<1x8x256xf32, #tpu.memory_space<vmem>>, vector<1x8x256xf32>
    %90 = vector.shape_cast %89 : vector<1x8x256xf32> to vector<8x256xf32>
    %91 = vector.shape_cast %88 : vector<8x256xf32> to vector<1x8x256xf32>
    tpu.vector_store %arg7[%c0_55, %c0_56, %c0_57], %91 {strides = array<i32>} : memref<1x8x256xf32, #tpu.memory_space<vmem>>, vector<1x8x256xf32>,
    return
  }
  func.func @transform_0(%arg0: i32) -> (i32, i32, i32) {
    %c0_i32 = arith.constant 0 : i32
    %c0_i32_0 = arith.constant 0 : i32
    %c0_i32_1 = arith.constant 0 : i32
    return %arg0, %c0_i32, %c0_i32_0 : i32, i32, i32
  }
  func.func @transform_1(%arg0: i32) -> (i32, i32) {
    %c0_i32 = arith.constant 0 : i32
    %c0_i32_0 = arith.constant 0 : i32
    %c0_i32_1 = arith.constant 0 : i32
    return %c0_i32, %c0_i32_0 : i32, i32
  }
  func.func @transform_2(%arg0: i32) -> (i32, i32) {
    %c0_i32 = arith.constant 0 : i32
    %c0_i32_0 = arith.constant 0 : i32
    %c0_i32_1 = arith.constant 0 : i32
    return %c0_i32, %c0_i32_0 : i32, i32
  }
  func.func @transform_3(%arg0: i32) -> (i32, i32) {
    %c0_i32 = arith.constant 0 : i32
    %c0_i32_0 = arith.constant 0 : i32
    %c0_i32_1 = arith.constant 0 : i32
    return %c0_i32, %c0_i32_0 : i32, i32
  }
  func.func @transform_4(%arg0: i32) -> (i32, i32) {
    %c0_i32 = arith.constant 0 : i32
    %c0_i32_0 = arith.constant 0 : i32
    %c0_i32_1 = arith.constant 0 : i32
    return %c0_i32, %c0_i32_0 : i32, i32
  }
  func.func @transform_5(%arg0: i32) -> (i32, i32) {
    %c0_i32 = arith.constant 0 : i32
    %c0_i32_0 = arith.constant 0 : i32
    %c0_i32_1 = arith.constant 0 : i32
    return %c0_i32, %c0_i32_0 : i32, i32
  }
  func.func @transform_6(%arg0: i32) -> (i32, i32, i32) {
    %c0_i32 = arith.constant 0 : i32
    %c0_i32_0 = arith.constant 0 : i32
    %c0_i32_1 = arith.constant 0 : i32
    return %arg0, %c0_i32, %c0_i32_0 : i32, i32, i32
  }
}

</mosaic_0001>

<bundles_post_ra>
// kernel: tpu_custom_call.1
= control target key start
LH: loop header
LB: loop body
LE: loop exit
PB: predicated region body
PF: predicated region fallthrough
CT: control target
= control target key end

     0   :  { %11 = vsyncpa [#allocation4], 0  ;;  %s1257_s0 = inlined_call_operand.vmem [shape: f32[2,4,256], index: 0, kind: input, shape index: {}]   ;;  %s1258_s1 = inlined_call_operand.vmem [shape: bf16[8,4], index: 1, kind: input, shape index: {}]   ;;  %s1259_s2 = inlined_call_operand.vmem [shape: f32[8,1], index: 2, kind: input, shape index: {}]   ;;  %s1260_s3 = inlined_call_operand.vmem [shape: f32[8,9], index: 3, kind: input, shape index: {}]   ;;  %s1261_s4 = inlined_call_operand.vmem [shape: f32[8,1], index: 4, kind: input, shape index: {}]   ;;  %s1262_s5 = inlined_call_operand.vmem [shape: f32[3,256], index: 5, kind: input, shape index: {}]   ;;  %s1263_s6 = inlined_call_operand.hbm [shape: f32[2,8,256], index: 6, kind: output, shape index: {}]  }
   0x1   :  { %13 = vsyncpa [#allocation4 + $0x1], 0  ;;  %s970_s21 = smov 0   ;;  %s972_s22 = smov 0  }
   0x2   :  { %s974_s23 = smov 0   ;;  %s976_s24 = smov 0  }
   0x3 LB: > { %s991_s25 = sadd.s32 4294967295, %s906_s24   ;;  %s750_s26 = sadd.s32 4294967294, %s906_s24   ;;  %s906_s24 = sphi %s976_s24, %s1269_s24   ;;  %s902_s23 = sphi %s974_s23, %s1268_s23   ;;  %s898_s22 = sphi %s972_s22, %s1267_s22   ;;  %s894_s21 = sphi %s970_s21, %s1266_s21  }
   0x4   : > { %s995_s27 = sadd.s32 1, %s906_s24   ;;  %s157_s28 = sadd.s32 1, %s902_s23 }
   0x5   : > { %s154_s29 = ssub.s32 %s906_s24, %s995_s27  ;;  %p167_p0 = scmp.ne.s32.totalorder %s902_s23, %s898_s22 }
   0x6   : > { %p155_p1 = scmp.eq.s32.totalorder %s154_s29, 0  ;;  %p168_p2 = scmp.eq.s32.totalorder %s991_s25, 1 }
   0x7   : > { %p173_p3 = scmp.ne.s32.totalorder %s898_s22, %s894_s21  ;;  %p174_p4 = scmp.eq.s32.totalorder %s750_s26, 1 }
   0x8   : > { %s1006_s30 = scalar_select %p155_p1, %s902_s23, %s157_s28  }
   0x9   : > { %p1008_p5 = por %p168_p2, %p167_p0  ;;  %p1012_p6 = por %p174_p4, %p173_p3 }
   0xa   : > { %p753_p7 = scmp.ge.s32.totalorder %s906_s24, 1  ;;  %p215_p8 = scmp.lt.s32.totalorder %s906_s24, 3 }
   0xc   : > { %p216_p9 = pnand %p753_p7, %p215_p8 }
   0xd   : > { %p245_p10 = scmp.lt.s32.totalorder (!%p216_p9), %s991_s25, 1  ;;  %v340_v0 = vlaneseq (!%p216_p9)  ;;  %v908_v1 = vmov (!%p216_p9), 0   ;;  %v258_v2 = vld [vmem:[%s1259_s2] sm:$0xff] (!%p216_p9)  ;;  %v909_v4 = vmov (!%p216_p9), 1   ;;  %vm268_vm0 = vcmask (!%p216_p9), 1041408   ;;  %s911_s20 = smov (!%p216_p9), 1  }
   0xe   : > { %219 = sbr.rel (%p216_p9) target bundleno = 559 (0x22f), region = 44  ;;  %307 = vmatprep.mubr.bf16.mxu0 (!%p216_p9), %v908_v1  ;;  %833 = vset.pattern.permute.xlu0 (!%p216_p9), %v908_v1  ;;  %v1027_v3 = vld [vmem:[%s1260_s3] sm:$0xff] (!%p216_p9)  ;;  %v910_v11 = vmov (!%p216_p9), 2   ;;  %v912_v18 = vmov (!%p216_p9), 3   ;;  %vm264_vm1 = vcmask (!%p216_p9), 31744   ;;  %s913_s10 = smov (!%p216_p9), 2  }
   0xf   : > { %261 = vperm.xlu0 (!%p216_p9), %833, %v258_v2   ;;  %834 = vset.pattern.permute.xlu1 (!%p216_p9), %v909_v4  ;;  %v341_v5 = vshrl.u32 (!%p216_p9), %v340_v0, 7  ;;  %v759_v6 = vld [vmem:[%s1262_s5 + $0x1] ss:$4 sm:$0x3] (!%p216_p9)  ;;  %v914_v22 = vmov (!%p216_p9), 4   ;;  %v915_v25 = vmov (!%p216_p9), 5  }
  0x10   : > { %388 = vperm.xlu1 (!%p216_p9), %834, %v1027_v3   ;;  %v760_v17 = vld [vmem:[%s1262_s5 + $0x2] ss:$4 sm:$0x3] (!%p216_p9)  ;;  %v338_v23 = vld [vmem:[%s1262_s5] ss:$4 sm:$0x3] (!%p216_p9) }
  0x11   : > { %v342_v7 = vsub.s32 (!%p216_p9), 0, %v341_v5  ;;  %v346_v8 = vsub.s32 (!%p216_p9), 1, %v341_v5  ;;  %v257_v19 = vld [vmem:[%s1258_s1] sm:$0xf] (!%p216_p9)  ;;  %s917_s14 = smov (!%p216_p9), 17   ;;  %s918_s15 = smov (!%p216_p9), 18  }
  0x12   : > { %v919_v27 = vmov (!%p216_p9), 6   ;;  %v920_v28 = vmov (!%p216_p9), 0.0   ;;  %vm318_vm2 = vcmask (!%p216_p9), 277504   ;;  %v921_v36 = vmov (!%p216_p9), 7   ;;  %s924_s17 = smov (!%p216_p9), 33   ;;  %s925_s18 = smov (!%p216_p9), 34  }
  0x13   : > { %v1037_v10 = vrot.slane (!%p216_p9), %v759_v6, %v342_v7  ;;  %835 = vset.pattern.permute.xlu0 (!%p216_p9), %v910_v11  ;;  %v1041_v14 = vrot.slane (!%p216_p9), %v759_v6, %v346_v8  ;;  %v416_v20 = vrot.slane (!%p216_p9), %v760_v17, %v342_v7  ;;  %v420_v21 = vrot.slane (!%p216_p9), %v760_v17, %v346_v8  ;;  %v664_v38 = vld [vmem:[%s1261_s4] sm:$0xff] (!%p216_p9)  ;;  %s926_s26 = smov (!%p216_p9), 112   ;;  %s927_s28 = smov (!%p216_p9), 127  }
  0x14   : > { %434 = vperm.xlu0 (!%p216_p9), %835, %v1027_v3   ;;  %v1055_v24 = vrot.slane (!%p216_p9), %v338_v23, %v342_v7  ;;  %v1059_v26 = vrot.slane (!%p216_p9), %v338_v23, %v346_v8  ;;  %316 = vst [vmem:[#allocation2] sm:$0xff] (!%p216_p9), %v920_v28  ;;  %319 = vst.msk [vmem:[#allocation2 + $0x10] sm:$0xff] (!%p216_p9), %vm318_vm2, %v920_v28  ;;  %v923_v37 = vmov (!%p216_p9), 8   ;;  %vm331_vm3 = vcmask (!%p216_p9), 1047688   ;;  %s928_s29 = smov (!%p216_p9), 110   ;;  %s929_s9 = smov (!%p216_p9), 126  }
  0x15   : > { %s246_s13 = scalar_select %p245_p10, %s991_s25, 1  ;;  %375 = vrot.lane.b32.xlu1 %v1037_v10, %s911_s20  ;;  %vm326_vm4 = vcmask 138240   ;;  %vm425_vm5 = vcmask 15360   ;;  %vm564_vm6 = vcmask 261120   ;;  %vm379_vm7 = vcmask 7168  }
  0x16   : > { %s931_s11 = smov 96   ;;  %s932_s12 = smov 95   ;;  %vm599_vm8 = vcmask 269312   ;;  %vm460_vm9 = vcmask 130048   ;;  %vm529_vm10 = vcmask 146432   ;;  %vm403_vm11 = vcmask 1039360  }
  0x17   : > { %s766_s16 = sshll.u32 %s246_s13, 3  ;;  %s916_s13 = smov 16   ;;  %vm449_vm12 = vcmask 1031168   ;;  %vm484_vm13 = vcmask 916480   ;;  %vm518_vm14 = vcmask 908288   ;;  %vm553_vm15 = vcmask 900096  }
  0x18   : > { %s249_s19 = scalar_lea.vmem %s1257_s0, %s766_s16  ;;  %836 = vset.pattern.permute.xlu0 %v912_v18  ;;  %s922_s16 = smov 32  }
  0x19   : > { %v251_v9 = vld [vmem:[%s249_s19] sm:$0xff]  ;;  %377 = vrot.lane.b32.xlu1 %v1041_v14, %s911_s20  ;;  %469 = vperm.xlu0 %836, %v1027_v3  }
  0x1a   : > { %v253_v12 = vcombine.high %v251_v9, %v251_v9  ;;  %v255_v13 = vpack.c.bf16 %v251_v9, %v251_v9 }
  0x1c   : > { %v256_v15 = vpack.c.bf16 %v253_v12, %v253_v12  ;;  %v270_v16 = vsel %vm268_vm0, %v255_v13, 0 }
  0x1d   : > { %421 = vrot.lane.b32.xlu1 %v416_v20, %s913_s10  ;;  %837 = vset.pattern.permute.xlu0 %v914_v22 }
  0x1e   : > { %757 = vmatprep.subr.msk.bf16.mxu0 %vm268_vm0, %v256_v15  ;;  %503 = vperm.xlu0 %837, %v1027_v3   ;;  %vm588_vm0 = vcmask 785408  }
  0x1f   : > { %276 = vmatpush1.bf16.msra.mxu0 %v270_v16 }
  0x21   : > { %423 = vrot.lane.b32.xlu1 %v420_v21, %s913_s10  ;;  %s930_s10 = smov 111  }
  0x22   : > { %758 = vmatmul.mubr.msk.bf16.vlgmr.msra.gmra.mrb[0].mxu0 %vm264_vm1, %v257_v19  ;;  %838 = vset.pattern.permute.xlu0 %v915_v25  ;;  %vm623_vm1 = vcmask 777216  }
  0x23   : > { %538 = vperm.xlu0 %838, %v1027_v3  }
  0x25   : > { %456 = vrot.lane.b32.xlu1 %v1055_v24, %s916_s13 }
  0x27   : > { %839 = vset.pattern.permute.xlu0 %v919_v27 }
  0x29   : > { %458 = vrot.lane.b32.xlu1 %v1059_v26, %s916_s13  ;;  %s933_s13 = smov 94  }
  0x2d   : > { %491 = vrot.lane.b32.xlu1 %v1037_v10, %s917_s14 }
  0x31   : > { %493 = vrot.lane.b32.xlu1 %v1041_v14, %s917_s14 }
  0x35   : > { %525 = vrot.lane.b32.xlu1 %v416_v20, %s918_s15 }
  0x8e   : > { %v262_v29 = vpop.permute.xlu0 %261 }
  0x8f   : > { %v1077_v39 = vpop.permute.xlu1 %388 }
  0x93   : > { %v1079_v40 = vpop.permute.xlu1 %375  ;;  %v1087_v45 = vpop.permute.xlu0 %434 }
  0x97   : > { %v1081_v41 = vpop.permute.xlu1 %377 }
  0x98   : > { %v1091_v47 = vpop.permute.xlu0 %469 }
  0x9b   : > { %v422_v42 = vpop.permute.xlu1 %421 }
  0x9d   : > { %v1095_v49 = vpop.permute.xlu0 %503 }
  0x9f   : > { %v1083_v43 = vpop.permute.xlu1 %423 }
  0xa0   : > { %v426_v18 = vsel %vm425_vm5, %v422_v42, %v1083_v43 }
  0xa2   : > { %v1099_v51 = vpop.permute.xlu0 %538 }
  0xa3   : > { %v1085_v44 = vpop.permute.xlu1 %456 }
  0xa7   : > { %v1089_v46 = vpop.permute.xlu1 %458 }
  0xab   : > { %v1093_v48 = vpop.permute.xlu1 %491 }
  0xaf   : > { %v1097_v50 = vpop.permute.xlu1 %493 }
  0xb0   : > { %v495_v25 = vsel %vm326_vm4, %v1093_v48, %v1097_v50 }
  0xb3   : > { %v1101_v52 = vpop.permute.xlu1 %525 }
  0xf5   : > { %v309_v30 = vpop.f32.mrb[0].mxu0 }
  0xf6   : > { %v310_v31 = vadd.f32 %v309_v30, %v262_v29  ;;  %v311_v32 = vpop.f32.mrb[1].mxu0 }
  0xf7   : > { %v312_v33 = vadd.f32 %v311_v32, %v262_v29  ;;  %v313_v34 = vpop.f32.mrb[2].mxu0 }
  0xf8   : > { %v314_v35 = vpop.f32.mrb[3].mxu0  ;;  %322 = vrot.lane.b32.xlu0 %v310_v31, %s917_s14 }
  0xf9   : > { %324 = vrot.lane.b32.xlu1 %v312_v33, %s917_s14  ;;  %s242_s14 = sand.u32 1, %s898_s22  }
  0xfc   : > { %573 = vperm.xlu0 %839, %v1027_v3  }
  0xfd   : > { %527 = vrot.lane.b32.xlu1 %v420_v21, %s918_s15  ;;  %s754_s15 = sshll.u32 %s242_s14, 4 }
 0x100   : > { %840 = vset.pattern.permute.xlu0 %v921_v36 }
 0x101   : > { %560 = vrot.lane.b32.xlu1 %v1055_v24, %s922_s16  ;;  %608 = vperm.xlu0 %840, %v1027_v3  }
 0x105   : > { %562 = vrot.lane.b32.xlu1 %v1059_v26, %s922_s16  ;;  %841 = vset.pattern.permute.xlu0 %v923_v37  ;;  %s767_s16 = sshll.u32 %s991_s25, 8  ;;  %s677_s25 = scalar_lea.sflag [#allocation4], %s242_s14 }
 0x106   : > { %642 = vperm.xlu0 %841, %v1027_v3  }
 0x109   : > { %595 = vrot.lane.b32.xlu1 %v1037_v10, %s924_s17 }
 0x10a   : > { %630 = vrot.lane.b32.xlu0 %v416_v20, %s925_s18 }
 0x10b   : > { %842 = vset.pattern.permute.xlu0 %v908_v1 }
 0x10d   : > { %597 = vrot.lane.b32.xlu1 %v1041_v14, %s924_s17  ;;  %s244_s17 = scalar_lea.vmem [#allocation3], %s754_s15 }
 0x10e   : > { %354 = vperm.xlu0 %842, %v1027_v3  }
 0x111   : > { %632 = vrot.lane.b32.xlu1 %v420_v21, %s925_s18  ;;  %s691_s18 = sshll.u32 %s244_s17, 4  ;;  %s1215_s18 = int_to_ptr.vmem [resolvable:$true] %s691_s18 }
 0x112   : > { %667 = vperm.xlu0 %842, %v664_v38   ;;  %v380_v38 = vsel %vm379_vm7, %v1079_v40, %v1081_v41 }
 0x16a   : > { %v323_v53 = vpop.permute.xlu0 %322 }
 0x16b   : > { %332 = vst.msk [vmem:[#allocation2] sm:$0xff] %vm331_vm3, %v323_v53  ;;  %v325_v54 = vpop.permute.xlu1 %324 }
 0x16c   : > { %v1104_v55 = vsel %vm326_vm4, %v323_v53, %v325_v54  ;;  %334 = vst.msk [vmem:[#allocation2 + $0x10] sm:$0xff] %vm326_vm4, %v325_v54 }
 0x16d   : > { %v431_v22 = vmul.f32 %v426_v18, %v1104_v55  ;;  %v500_v29 = vmul.f32 %v495_v25, %v1104_v55  ;;  %v351_v18 = vmul.f32 %v1059_v26, %v1104_v55 }
 0x16f   : > { %v1107_v56 = vpop.permute.xlu1 %527  ;;  %v438_v27 = vmul.f32 %v1087_v45, %v431_v22  ;;  %v507_v33 = vmul.f32 %v1095_v49, %v500_v29 }
 0x172   : > { %v1109_v57 = vld [vmem:[#allocation2] sm:$0xff] }
 0x173   : > { %v465_v58 = vmul.f32 %v1085_v44, %v1109_v57  ;;  %v384_v59 = vmul.f32 %v1079_v40, %v1109_v57  ;;  %v561_v60 = vpop.permute.xlu1 %560  ;;  %v534_v63 = vmul.f32 %v1101_v52, %v1109_v57  ;;  %v430_v0 = vmul.f32 %v422_v42, %v1109_v57  ;;  %v1120_v1 = vld [vmem:[#allocation2 + $0x10] sm:$0xff] }
 0x174   : > { %v386_v4 = vmul.f32 %v1081_v41, %v1120_v1  ;;  %v499_v5 = vmul.f32 %v1093_v48, %v1109_v57  ;;  %v467_v10 = vmul.f32 %v1089_v46, %v1120_v1  ;;  %v569_v11 = vmul.f32 %v561_v60, %v1109_v57 }
 0x175   : > { %v472_v61 = vmul.f32 %v1091_v47, %v465_v58  ;;  %v391_v62 = vmul.f32 %v1077_v39, %v384_v59  ;;  %v541_v2 = vmul.f32 %v1099_v51, %v534_v63  ;;  %v437_v3 = vmul.f32 %v1087_v45, %v430_v0 }
 0x176   : > { %v393_v8 = vmul.f32 %v1077_v39, %v386_v4  ;;  %v506_v9 = vmul.f32 %v1095_v49, %v499_v5  ;;  %v536_v14 = vmul.f32 %v1107_v56, %v1120_v1  ;;  %v474_v16 = vmul.f32 %v1091_v47, %v467_v10 }
 0x177   : > { %478 = vrot.lane.b32.xlu0 %v472_v61, %s926_s26  ;;  %397 = vrot.lane.b32.xlu1 %v391_v62, %s927_s28  ;;  %v563_v6 = vpop.permute.xlu1 %562  ;;  %v432_v23 = vmul.f32 %v1083_v43, %v1120_v1  ;;  %v501_v30 = vmul.f32 %v1097_v50, %v1120_v1  ;;  %v385_v48 = vmul.f32 %v380_v38, %v1104_v55 }
 0x178   : > { %v543_v19 = vmul.f32 %v1099_v51, %v536_v14  ;;  %v565_v35 = vsel %vm564_vm6, %v561_v60, %v563_v6  ;;  %v571_v36 = vmul.f32 %v563_v6, %v1120_v1  ;;  %v461_v50 = vsel %vm460_vm9, %v1085_v44, %v1089_v46 }
 0x179   : > { %v439_v28 = vmul.f32 %v1087_v45, %v432_v23  ;;  %v508_v34 = vmul.f32 %v1095_v49, %v501_v30  ;;  %v570_v42 = vmul.f32 %v565_v35, %v1104_v55  ;;  %v392_v40 = vmul.f32 %v1077_v39, %v385_v48 }
 0x17a   : > { %v466_v41 = vmul.f32 %v461_v50, %v1104_v55  ;;  %v530_v58 = vsel %vm529_vm10, %v1101_v52, %v1107_v56 }
 0x17b   : > { %547 = vrot.lane.b32.xlu0 %v541_v2, %s928_s29  ;;  %443 = vrot.lane.b32.xlu1 %v437_v3, %s929_s9  ;;  %v574_v7 = vpop.permute.xlu0 %573  ;;  %v596_v12 = vpop.permute.xlu1 %595  ;;  %v535_v60 = vmul.f32 %v530_v58, %v1104_v55 }
 0x17c   : > { %v576_v15 = vmul.f32 %v574_v7, %v569_v11  ;;  %v604_v17 = vmul.f32 %v596_v12, %v1109_v57  ;;  %v578_v43 = vmul.f32 %v574_v7, %v571_v36  ;;  %v577_v53 = vmul.f32 %v574_v7, %v570_v42 }
 0x17d   : > { %v473_v46 = vmul.f32 %v1091_v47, %v466_v41  ;;  %v542_v56 = vmul.f32 %v1099_v51, %v535_v60 }
 0x17f   : > { %401 = vrot.lane.b32.xlu0 %v393_v8, %s927_s28  ;;  %512 = vrot.lane.b32.xlu1 %v506_v9, %s930_s10  ;;  %v598_v37 = vpop.permute.xlu1 %597 }
 0x180   : > { %v1139_v13 = vpop.permute.xlu0 %608  ;;  %v600_v49 = vsel %vm599_vm8, %v596_v12, %v598_v37  ;;  %v606_v39 = vmul.f32 %v598_v37, %v1120_v1 }
 0x181   : > { %v611_v20 = vmul.f32 %v1139_v13, %v604_v17  ;;  %v605_v54 = vmul.f32 %v600_v49, %v1104_v55  ;;  %v350_v17 = vmul.f32 %v1109_v57, %v1055_v24 }
 0x182   : > { %v613_v63 = vmul.f32 %v1139_v13, %v606_v39 }
 0x183   : > { %482 = vrot.lane.b32.xlu0 %v474_v16, %s926_s26  ;;  %582 = vrot.lane.b32.xlu1 %v576_v15, %s931_s11  ;;  %v633_v59 = vpop.permute.xlu1 %632  ;;  %v612_v61 = vmul.f32 %v1139_v13, %v605_v54 }
 0x184   : > { %v640_v44 = vmul.f32 %v633_v59, %v1120_v1 }
 0x185   : > { %v643_v21 = vpop.permute.xlu0 %642 }
 0x186   : > { %v647_v52 = vmul.f32 %v643_v21, %v640_v44 }
 0x187   : > { %551 = vrot.lane.b32.xlu0 %v543_v19, %s928_s29  ;;  %617 = vrot.lane.b32.xlu1 %v611_v20, %s932_s12 }
 0x189   : > { %v631_v31 = vpop.permute.xlu0 %630 }
 0x18a   : > { %v638_v32 = vmul.f32 %v631_v31, %v1109_v57  ;;  %v634_v62 = vsel %vm318_vm2, %v631_v31, %v633_v59  ;;  %vm657_vm2 = vcmask 769024  }
 0x18b   : > { %445 = vrot.lane.b32.xlu0 %v438_v27, %s929_s9  ;;  %447 = vrot.lane.b32.xlu1 %v439_v28, %s929_s9  ;;  %v639_v0 = vmul.f32 %v634_v62, %v1104_v55 }
 0x18c   : > { %v645_v45 = vmul.f32 %v643_v21, %v638_v32 }
 0x18d   : > { %v646_v47 = vmul.f32 %v643_v21, %v639_v0  ;;  %v355_v2 = vpop.permute.xlu0 %354 }
 0x18e   : > { %v357_v20 = vmul.f32 %v355_v2, %v350_v17  ;;  %v358_v21 = vmul.f32 %v355_v2, %v351_v18 }
 0x18f   : > { %514 = vrot.lane.b32.xlu0 %v507_v33, %s930_s10  ;;  %516 = vrot.lane.b32.xlu1 %v508_v34, %s930_s10 }
 0x191   : > { %v1198_v3 = vpop.permute.xlu0 %667 }
 0x193   : > { %586 = vrot.lane.b32.xlu1 %v578_v43, %s931_s11  ;;  %651 = vrot.lane.b32.xlu0 %v645_v45, %s933_s13 }
 0x197   : > { %399 = vrot.lane.b32.xlu1 %v392_v40, %s927_s28  ;;  %584 = vrot.lane.b32.xlu0 %v577_v53, %s931_s11  ;;  %s844_s28 = scalar_lea.vmem %s1215_s18, 256 }
 0x198   : > { %p845_p11 = scmp.ne.s32.totalorder %s1215_s18, %s844_s28 }
 0x19a   : > { %p846_p12 = pnand %p845_p11, %p1008_p5 }
 0x19b   : > { %480 = vrot.lane.b32.xlu1 %v473_v46, %s926_s26  ;;  %619 = vrot.lane.b32.xlu0 %v612_v61, %s932_s12  ;;  %s1213_s26 = scalar_lea.hbm %s1263_s6, %s767_s16 }
 0x19c   : > { %p847_p13 = pneg %p846_p12 }
 0x19f   : > { %549 = vrot.lane.b32.xlu1 %v542_v56, %s928_s29  ;;  %655 = vrot.lane.b32.xlu0 %v647_v52, %s933_s13  ;;  %s934_s29 = smov [#allocation3]  }
 0x1a0   : > { %s848_s9 = sshll.u32 %s934_s29, 4  ;;  %s849_s9 = int_to_ptr.vmem [resolvable:$false] %s848_s9 }
 0x1a1   : > { %s850_s10 = scalar_lea.vmem %s849_s9, 512  ;;  %p851_p0 = scmp.lt.s32.totalorder %s1215_s18, %s849_s9 }
 0x1a2   : > { %p852_p1 = scmp.lt.s32.totalorder %s850_s10, %s844_s28 }
 0x1a3   : > { %621 = vrot.lane.b32.xlu1 %v613_v63, %s932_s12 }
 0x1a4   : > { %p853_p2 = por %p852_p1, %p851_p0 }
 0x1a6   : > { %p854_p3 = pnand %p853_p2, %p847_p13 }
 0x1a7   : > { %653 = vrot.lane.b32.xlu1 %v646_v47, %s933_s13 }
 0x1e9   : > { %v398_v1 = vpop.permute.xlu1 %397  ;;  %v479_v4 = vpop.permute.xlu0 %478 }
 0x1ed   : > { %v444_v5 = vpop.permute.xlu1 %443  ;;  %v548_v51 = vpop.permute.xlu0 %547 }
 0x1f1   : > { %v513_v6 = vpop.permute.xlu1 %512  ;;  %v402_v7 = vpop.permute.xlu0 %401 }
 0x1f5   : > { %v583_v8 = vpop.permute.xlu1 %582  ;;  %v483_v9 = vpop.permute.xlu0 %482 }
 0x1f9   : > { %v618_v10 = vpop.permute.xlu1 %617  ;;  %v552_v11 = vpop.permute.xlu0 %551 }
 0x1fd   : > { %v448_v12 = vpop.permute.xlu1 %447  ;;  %v446_v13 = vpop.permute.xlu0 %445 }
 0x1fe   : > { %v450_v29 = vsel %vm449_vm12, %v444_v5, %v446_v13  ;;  %v451_v30 = vsel %vm449_vm12, %v446_v13, %v448_v12 }
 0x201   : > { %v517_v14 = vpop.permute.xlu1 %516  ;;  %v515_v15 = vpop.permute.xlu0 %514 }
 0x202   : > { %v519_v35 = vsel %vm518_vm14, %v513_v6, %v515_v15  ;;  %v520_v36 = vsel %vm518_vm14, %v515_v15, %v517_v14 }
 0x205   : > { %v587_v16 = vpop.permute.xlu1 %586  ;;  %v652_v19 = vpop.permute.xlu0 %651 }
 0x209   : > { %v400_v22 = vpop.permute.xlu1 %399  ;;  %v585_v31 = vpop.permute.xlu0 %584 }
 0x20a   : > { %v404_v23 = vsel %vm403_vm11, %v398_v1, %v400_v22  ;;  %v405_v25 = vsel %vm403_vm11, %v400_v22, %v402_v7  ;;  %v589_v53 = vsel %vm588_vm0, %v583_v8, %v585_v31  ;;  %v590_v54 = vsel %vm588_vm0, %v585_v31, %v587_v16 }
 0x20b   : > { %v408_v27 = vadd.f32 %v404_v23, %v357_v20  ;;  %v409_v28 = vadd.f32 %v405_v25, %v358_v21 }
 0x20d   : > { %v481_v32 = vpop.permute.xlu1 %480  ;;  %v454_v24 = vadd.f32 %v450_v29, %v408_v27  ;;  %v455_v57 = vadd.f32 %v451_v30, %v409_v28  ;;  %v620_v48 = vpop.permute.xlu0 %619 }
 0x20e   : > { %v485_v33 = vsel %vm484_vm13, %v479_v4, %v481_v32  ;;  %v486_v26 = vsel %vm484_vm13, %v481_v32, %v483_v9  ;;  %v624_v60 = vsel %vm623_vm1, %v618_v10, %v620_v48 }
 0x20f   : > { %v489_v55 = vadd.f32 %v485_v33, %v454_v24  ;;  %v490_v34 = vadd.f32 %v486_v26, %v455_v57 }
 0x211   : > { %v550_v37 = vpop.permute.xlu1 %549  ;;  %v523_v38 = vadd.f32 %v519_v35, %v489_v55  ;;  %v524_v42 = vadd.f32 %v520_v36, %v490_v34  ;;  %v656_v61 = vpop.permute.xlu0 %655 }
 0x212   : > { %v554_v43 = vsel %vm553_vm15, %v548_v51, %v550_v37  ;;  %v555_v45 = vsel %vm553_vm15, %v550_v37, %v552_v11 }
 0x213   : > { %v558_v49 = vadd.f32 %v554_v43, %v523_v38  ;;  %v559_v50 = vadd.f32 %v555_v45, %v524_v42 }
 0x215   : > { %v593_v40 = vadd.f32 %v589_v53, %v558_v49  ;;  %v622_v41 = vpop.permute.xlu1 %621  ;;  %v594_v58 = vadd.f32 %v590_v54, %v559_v50 }
 0x216   : > { %v625_v59 = vsel %vm623_vm1, %v620_v48, %v622_v41 }
 0x217   : > { %v629_v44 = vadd.f32 %v625_v59, %v594_v58  ;;  %v628_v39 = vadd.f32 %v624_v60, %v593_v40 }
 0x219   : > { %v654_v46 = vpop.permute.xlu1 %653 }
 0x21a   : > { %v658_v52 = vsel %vm657_vm2, %v652_v19, %v654_v46  ;;  %v659_v56 = vsel %vm657_vm2, %v654_v46, %v656_v61 }
 0x21b   : > { %v662_v62 = vadd.f32 %v658_v52, %v628_v39  ;;  %v663_v63 = vadd.f32 %v659_v56, %v629_v44 }
 0x21d   : > { %v670_v0 = vadd.f32 %v1198_v3, %v662_v62  ;;  %v671_v47 = vadd.f32 %v1198_v3, %v663_v63 }
 0x21f   : > { %v672_v2 = vmax.f32 %v670_v0, 0.0  ;;  %v673_v1 = vmax.f32 %v671_v47, 0.0 }
 0x221   : > { %674 = vst [vmem:[%s244_s17] sm:$0xff] %v672_v2  ;;  %675 = vst [vmem:[%s244_s17 + $0x8] sm:$0xff] %v673_v1 }
 0x222   : > { %857 = shalt.err (!%p854_p3)
}
 0x223   : > { %s858_s11 = scalar_lea.hbm %s1213_s26, 256  ;;  %s862_s14 = scalar_lea.hbm %s1263_s6, 512 }
 0x224   : > { %p859_p4 = scmp.ne.s32.totalorder %s1213_s26, %s858_s11  ;;  %p863_p9 = scmp.lt.u32.totalorder %s1213_s26, %s1263_s6 }
 0x225   : > { %p864_p10 = scmp.lt.u32.totalorder %s862_s14, %s858_s11  ;;  %p866_p12 = scmp.lt.u32.totalorder %s858_s11, %s1213_s26 }
 0x226   : > { %p860_p7 = pnand %p859_p4, %p1008_p5 }
 0x227   : > { %p865_p11 = por %p864_p10, %p863_p9 }
 0x228   : > { %p861_p8 = pneg %p860_p7 }
 0x229   : > { %p867_p13 = por %p866_p12, %p865_p11 }
 0x22b   : > { %p868_p0 = pnand %p867_p13, %p861_p8 }
 0x22d   : > { %871 = shalt.err (!%p868_p0)
}
 0x22e   : > { %768 = dma.vmem_to_hbm [thread:$0]  (%p1008_p5), %s1215_s18, 256, %s1213_s26, %s677_s25  }
 0x22f PF: > { %p774_p1 = scmp.ge.s32.totalorder %s906_s24, 2  ;;  %s703_s17 = sand.u32 1, %s894_s21  }
 0x230   : > { %s704_s19 = scalar_lea.sflag [#allocation4], %s703_s17 }
 0x231   : > { %p771_p2 = pnand %p774_p1, %p1012_p6 }
 0x233   : > { %889 = dma.done.wait (!%p771_p2), %s704_s19, 256  }
 0x234   : > { %891 = vsyncadd (!%p771_p2), %s704_s19, 4294967040  ;;  %p16_p3 = scmp.ge.s32.totalorder %s995_s27, 4   ;;  %s1266_s21 = smov %s898_s22 }
 0x235   : > { %s1267_s22 = smov %s902_s23  ;;  %s1268_s23 = smov %s1006_s30 }
 0x236   : > { %s1269_s24 = smov %s995_s27  ;;  %18 = sbr.rel (!%p16_p3) target bundleno = 3 (0x3), region = 81 }
 0x23d   :  { %709 = vsyncpa [#allocation4], 1 }
 0x23e   :  { %711 = vsyncpa [#allocation4 + $0x1], 1 }

</bundles_post_ra>
